<compile_context>
chip_gen: v7x
topology: tpu7x:2x2x1
jax: 0.10.0
libtpu: 0.0.40
codegen_flags: <defaults>
</compile_context>

<pallas_src>
import jax
import jax.numpy as jnp
from jax.experimental import pallas as pl
from jax.experimental.pallas import tpu as pltpu


def _cat_mm_kernel(x1_ref, x2_ref, o_ref):
    """x1_ref: (1, 6) f32
       x2_ref: (1, 6) f32  (x2 flattened; bit-identical to (6,1) transposed)
       o_ref : (1, 14) f32 = [x1 | x2 | v | v]  with v = x1 @ x2 (scalar)."""
    x1 = x1_ref[...]                                  # (1, 6)
    x2 = x2_ref[...]                                  # (1, 6)

    # torch.mm(x1:(1,6), x2:(6,1)) == sum(x1 * x2_flat) -> (1,1).
    # Computed ONCE (v1 == v2 by construction).  Stays on VPU (mul) + XLU
    # (cross-lane reduce); the MXU would cost a full systolic pass for 6 MACs.
    v = jnp.sum(x1 * x2, axis=-1, keepdims=True)      # (1, 1)

    # Compose the full output row in registers; single store.
    o_ref[...] = jnp.concatenate([x1, x2, v, v], axis=-1)   # (1, 14)


def cat_mm(x1: jax.Array, x2: jax.Array) -> jax.Array:
    """x1: (1, 6) f32, x2: (6, 1) f32 -> (14,) f32."""
    assert x1.shape == (1, 6) and x2.shape == (6, 1)
    # Explicit dtype contract: kernel operates in f32.
    if x1.dtype != jnp.float32:
        x1 = x1.astype(jnp.float32)
    if x2.dtype != jnp.float32:
        x2 = x2.astype(jnp.float32)

    # reshape (not .T, not concat): bit-identical view for a contiguous (6,1)
    # array -> no transpose op, no materialized packing buffer in HBM.
    x2_row = x2.reshape(1, 6)

    out = pl.pallas_call(
        _cat_mm_kernel,
        out_shape=jax.ShapeDtypeStruct((1, 14), jnp.float32),
        in_specs=[
            pl.BlockSpec(memory_space=pltpu.MemorySpace.VMEM),
            pl.BlockSpec(memory_space=pltpu.MemorySpace.VMEM),
        ],
        out_specs=pl.BlockSpec(memory_space=pltpu.MemorySpace.VMEM),
        cost_estimate=pl.CostEstimate(
            flops=12, transcendentals=0, bytes_accessed=104
        ),
    )(x1, x2_row)

    return out.reshape(14)


if __name__ == "__main__":
    key = jax.random.PRNGKey(0)
    k1, k2 = jax.random.split(key)
    x1 = jax.random.normal(k1, (1, 6), dtype=jnp.float32)
    x2 = jax.random.normal(k2, (6, 1), dtype=jnp.float32)

    result = cat_mm(x1, x2)
    jax.block_until_ready(result)

    # Reference check (pure JAX)
    v = (x1 @ x2).reshape(-1)
    ref = jnp.concatenate([x1.reshape(-1), x2.reshape(-1), v, v])
    assert result.shape == (14,), result.shape
    assert jnp.allclose(result, ref, atol=1e-5), (result, ref)

    print("KERNEL_OK")
</pallas_src>

<mosaic_0001>
module attributes {stable_mosaic.version = 11 : i64} {
  func.func @_cat_mm_kernel(%arg0: memref<1x6xf32, #tpu.memory_space<vmem>>, %arg1: memref<1x6xf32, #tpu.memory_space<vmem>>, %arg2: memref<1x14xf32, #tpu.memory_space<vmem>>) attributes {dimension_semantics = [], scalar_prefetch = 0 : i64, scratch_operands = 0 : i64, tpu.core_type = #tpu.core_type<tc>} {
    %c0 = arith.constant 0 : index
    %c0_0 = arith.constant 0 : index
    %0 = vector.load %arg0[%c0, %c0_0] : memref<1x6xf32, #tpu.memory_space<vmem>>, vector<1x6xf32>
    %c0_1 = arith.constant 0 : index
    %c0_2 = arith.constant 0 : index
    %1 = vector.load %arg1[%c0_1, %c0_2] : memref<1x6xf32, #tpu.memory_space<vmem>>, vector<1x6xf32>
    %2 = arith.mulf %0, %1 : vector<1x6xf32>
    %cst = arith.constant dense<0.000000e+00> : vector<1xf32>
    %3 = vector.multi_reduction <add>, %2, %cst [1] : vector<1x6xf32> to vector<1xf32>
    %4 = vector.shape_cast %3 : vector<1xf32> to vector<1x1xf32>
    %5 = tpu.concatenate %0, %1, %4, %4 in 1 : vector<1x6xf32>, vector<1x6xf32>, vector<1x1xf32>, vector<1x1xf32> -> vector<1x14xf32>
    %c0_3 = arith.constant 0 : index
    %c0_4 = arith.constant 0 : index
    %6 = vector.load %arg2[%c0_3, %c0_4] : memref<1x14xf32, #tpu.memory_space<vmem>>, vector<1x14xf32>
    tpu.vector_store %arg2[%c0_3, %c0_4], %5 {strides = array<i32>} : memref<1x14xf32, #tpu.memory_space<vmem>>, vector<1x14xf32>,
    return
  }
}

</mosaic_0001>

<bundles_post_ra>
// kernel: tpu_custom_call.1
= control target key start
LH: loop header
LB: loop body
LE: loop exit
PB: predicated region body
PF: predicated region fallthrough
CT: control target
= control target key end

     0   :  { %7 = vsyncpa [#allocation3], 0  ;;  %s158_s0 = inlined_call_operand.hbm [shape: f32[1,6], index: 0, kind: input, shape index: {}]   ;;  %s159_s1 = inlined_call_operand.vmem [shape: f32[1,6], index: 1, kind: input, shape index: {}]   ;;  %s160_s2 = inlined_call_operand.hbm [shape: f32[1,14], index: 2, kind: output, shape index: {}]  }
   0x1   :  { %8 = vsyncpa [#allocation4], 0  ;;  %s113_s9 = smov [#allocation2]   ;;  %s65_s13 = scalar_lea.hbm %s158_s0, 16 }
   0x2   :  { %s15_s10 = sshll.u32 %s113_s9, 4  ;;  %p66_p0 = scmp.ne.s32.totalorder %s158_s0, %s65_s13  ;;  %s16_s10 = int_to_ptr.vmem [resolvable:$true] %s15_s10 }
   0x3   :  { %p69_p1 = scmp.lt.u32.totalorder %s65_s13, %s158_s0 }
   0x5   :  { %p71_p2 = pnand %p69_p1, %p66_p0 }
   0x7   :  { %74 = shalt.err (!%p71_p2)
}
   0x8   :  { %s75_s18 = scalar_lea.vmem %s16_s10, 16  ;;  %s79_s19 = scalar_lea.vmem %s16_s10, 32 }
   0x9   :  { %p76_p3 = scmp.ne.s32.totalorder %s16_s10, %s75_s18  ;;  %p80_p4 = scmp.lt.s32.totalorder %s16_s10, %s16_s10 }
   0xa   :  { %p81_p5 = scmp.lt.s32.totalorder %s79_s19, %s75_s18 }
   0xc   :  { %p82_p6 = por %p81_p5, %p80_p4 }
   0xe   :  { %p83_p7 = pnand %p82_p6, %p76_p3 }
  0x10   :  { %86 = shalt.err (!%p83_p7)
}
  0x11   :  { %18 = dma.hbm_to_vmem [thread:$0]  %s158_s0, 16, %s16_s10, [#allocation3]  }
  0x12   :  { %109 = dma.done.wait [#allocation3], 16  }
  0x13   :  { %110 = vsyncadd [#allocation3], 4294967280  ;;  %v24_v0 = vld [vmem:[#allocation2] sm:$0x1]  ;;  %vm27_vm0 = vcmask 40960   ;;  %v32_v4 = vlaneseq  ;;  %s114_s24 = smov 6  }
  0x14   :  { %v25_v1 = vld [vmem:[%s159_s1] sm:$0x1]  ;;  %vm39_vm1 = vcmask 48128   ;;  %vm41_vm2 = vcmask 97280   ;;  %s115_s0 = smov [#allocation5]   ;;  %vm43_vm3 = vcmask 105472  }
  0x15   :  { %v26_v2 = vmul.f32 %v25_v1, %v24_v0  ;;  %v33_v5 = vshrl.u32 %v32_v4, 7  ;;  %s53_s25 = sshll.u32 %s115_s0, 4  ;;  %vm45_vm4 = vcmask 106496   ;;  %s54_s25 = int_to_ptr.vmem [resolvable:$true] %s53_s25 }
  0x16   :  { %s87_s1 = scalar_lea.vmem %s54_s25, 16  ;;  %s91_s26 = scalar_lea.vmem %s54_s25, 32 }
  0x17   :  { %v28_v3 = vsel %vm27_vm0, %v26_v2, 0.0  ;;  %v34_v6 = vsub.s32 0, %v33_v5  ;;  %p88_p8 = scmp.ne.s32.totalorder %s54_s25, %s87_s1  ;;  %p92_p9 = scmp.lt.s32.totalorder %s54_s25, %s54_s25 }
  0x18   :  { %29 = vadd.xlane.f32.xlu0 %v28_v3  ;;  %p93_p10 = scmp.lt.s32.totalorder %s91_s26, %s87_s1 }
  0x19   :  { %v35_v7 = vrot.slane %v25_v1, %v34_v6 }
  0x1a   :  { %p94_p11 = por %p93_p10, %p92_p9 }
  0x1c   :  { %p95_p12 = pnand %p94_p11, %p88_p8 }
  0x2e   :  { %36 = vrot.lane.b32.xlu0 %v35_v7, %s114_s24 }
  0xa5   :  { %v30_v8 = vpop.xlane.xlu0 %29 }
  0xa9   :  { %v37_v9 = vpop.permute.xlu0 %36 }
  0xaa   :  { %v40_v10 = vsel %vm39_vm1, %v24_v0, %v37_v9 }
  0xab   :  { %v42_v11 = vsel %vm41_vm2, %v40_v10, %v30_v8 }
  0xac   :  { %v44_v12 = vsel %vm43_vm3, %v42_v11, %v30_v8 }
  0xad   :  { %46 = vst.msk [vmem:[#allocation5] sm:$0x1] %vm45_vm4, %v44_v12 }
  0xae   :  { %98 = shalt.err (!%p95_p12)
}
  0xaf   :  { %s99_s29 = scalar_lea.hbm %s160_s2, 16 }
  0xb0   :  { %p100_p13 = scmp.ne.s32.totalorder %s160_s2, %s99_s29  ;;  %p103_p0 = scmp.lt.u32.totalorder %s99_s29, %s160_s2 }
  0xb2   :  { %p105_p1 = pnand %p103_p0, %p100_p13 }
  0xb4   :  { %108 = shalt.err (!%p105_p1)
}
  0xb5   :  { %56 = dma.vmem_to_hbm [thread:$0]  %s54_s25, 16, %s160_s2, [#allocation4]  }
  0xb6   :  { %111 = dma.done.wait [#allocation4], 16  }
  0xb7   :  { %112 = vsyncadd [#allocation4], 4294967280 }
  0xb8   :  { %60 = vsyncpa [#allocation3], 1 }
  0xb9   :  { %61 = vsyncpa [#allocation4], 1 }

</bundles_post_ra>
